<compile_context>
chip_gen: v7x
topology: tpu7x:2x2x1
jax: 0.10.0
libtpu: 0.0.40
codegen_flags: <defaults>
</compile_context>

<pallas_src>
import functools
import math

import jax
import jax.numpy as jnp
from jax.experimental import pallas as pl
from jax.experimental.pallas import tpu as pltpu


# ----------------------------------------------------------------------------
# Tiling constants
# ----------------------------------------------------------------------------
_LANE_TILE = 512              # lane-axis tile: multiple of 128 -> unmasked stores
_SUB_TILE = 512               # sublane-axis tile: multiple of 8/16/32 packing
_TARGET_BLOCK_BYTES = 2 << 20  # ~2 MiB input block -> ~8 MiB double-buffered total
_VMEM_SOFT_LIMIT = 12 << 20    # raise the scoped VMEM limit above this footprint


def _pick_tile(size, cap):
    """Full extent if it fits the cap, otherwise the aligned cap."""
    return size if size <= cap else cap


# ----------------------------------------------------------------------------
# Kernel builder (cached per shape/dtype/dims so repeated calls reuse the jit)
# ----------------------------------------------------------------------------
@functools.lru_cache(maxsize=None)
def _build_transpose(shape, dtype_name, dim0, dim1):
    """Build a jitted pallas_call computing x.transpose(dim0, dim1) (dim0 < dim1)."""
    ndim = len(shape)
    dtype = jnp.dtype(dtype_name)
    itemsize = dtype.itemsize

    perm = list(range(ndim))
    perm[dim0], perm[dim1] = dim1, dim0
    perm = tuple(perm)
    out_shape = tuple(shape[p] for p in perm)

    blocks = [1] * ndim
    if dim0 >= ndim - 2:
        # ---- Path A: swapping the trailing two axes (TransApp hot path). ----
        m, n = shape[ndim - 2], shape[ndim - 1]
        blocks[ndim - 2] = _pick_tile(m, _SUB_TILE)   # becomes output lane dim
        blocks[ndim - 1] = _pick_tile(n, _LANE_TILE)
        if ndim >= 3:
            slab = blocks[ndim - 2] * blocks[ndim - 1] * itemsize
            blocks[ndim - 3] = max(
                1, min(shape[ndim - 3], _TARGET_BLOCK_BYTES // max(slab, 1)))
    elif dim1 < ndim - 2:
        # ---- Path B: both swapped axes are leading batch axes. --------------
        # Permutation lives entirely in the index maps; kernel body is a copy.
        blocks[ndim - 2] = _pick_tile(shape[ndim - 2], _SUB_TILE)
        blocks[ndim - 1] = _pick_tile(shape[ndim - 1], _LANE_TILE)
        if ndim >= 3 and (ndim - 3) not in (dim0, dim1):
            slab = blocks[ndim - 2] * blocks[ndim - 1] * itemsize
            blocks[ndim - 3] = max(
                1, min(shape[ndim - 3], _TARGET_BLOCK_BYTES // max(slab, 1)))
    else:
        # ---- Path C: one leading axis swapped with one minor axis. ----------
        # TODO(synk): fully tile the leading<->minor pair (128-aligned block on
        # the axis that becomes the output lane dim) for very large mixed-axis
        # transposes; current blocks keep both swapped axes whole.
        blocks[dim0] = shape[dim0]
        blocks[dim1] = shape[dim1]
        other_minor = ndim - 2 if dim1 == ndim - 1 else ndim - 1
        cap = _SUB_TILE if other_minor == ndim - 2 else _LANE_TILE
        blocks[other_minor] = _pick_tile(shape[other_minor], cap)

    blocks = tuple(blocks)
    out_blocks = tuple(blocks[p] for p in perm)
    grid = tuple(pl.cdiv(shape[a], blocks[a]) for a in range(ndim))
    # If both swapped axes are blocked at 1 the in-block permute is a no-op.
    copy_only = blocks[dim0] == 1 and blocks[dim1] == 1

    def kernel(x_ref, o_ref):
        blk = x_ref[...]
        if not copy_only:                       # static Python flag
            blk = jnp.transpose(blk, perm)
        o_ref[...] = blk

    # Footprint: (input block + output block) x double buffering.
    block_bytes = math.prod(blocks) * itemsize
    footprint = 4 * block_bytes
    params = {"dimension_semantics": ("parallel",) * ndim}
    if footprint > _VMEM_SOFT_LIMIT:
        params["vmem_limit_bytes"] = int(min(footprint + (4 << 20), 64 << 20))

    call = pl.pallas_call(
        kernel,
        out_shape=jax.ShapeDtypeStruct(out_shape, dtype),
        grid=grid,
        in_specs=[pl.BlockSpec(blocks, lambda *idx: idx)],
        out_specs=pl.BlockSpec(out_blocks,
                               lambda *idx: tuple(idx[p] for p in perm)),
        compiler_params=pltpu.CompilerParams(**params),
    )
    return jax.jit(call)


# ----------------------------------------------------------------------------
# Public wrapper (mirrors torch semantics)
# ----------------------------------------------------------------------------
def pallas_transpose(x, dim0, dim1, contiguous=False):
    """Pallas equivalent of `x.transpose(dim0, dim1)` (torch semantics).

    `contiguous` is accepted for interface parity; it is a no-op because JAX /
    Pallas results are always dense, contiguous arrays.
    """
    del contiguous
    ndim = x.ndim
    dim0 %= ndim
    dim1 %= ndim
    if dim0 == dim1:
        return x
    if dim0 > dim1:
        dim0, dim1 = dim1, dim0
    fn = _build_transpose(tuple(x.shape), jnp.dtype(x.dtype).name, dim0, dim1)
    return fn(x)


class Transpose:
    """Mirror of the PyTorch module interface."""

    def __init__(self, *dims, contiguous=False):
        assert len(dims) == 2, "torch.transpose takes exactly two dims"
        self.dims = dims
        self.contiguous = contiguous

    def __call__(self, x):
        return pallas_transpose(x, *self.dims, contiguous=self.contiguous)


# ----------------------------------------------------------------------------
if __name__ == "__main__":
    key = jax.random.PRNGKey(0)
    ks = jax.random.split(key, 5)

    # 1) TransApp usage: Transpose(1, 2) on an NCL activation
    #    (batch, d_model, seq_len) -> (batch, seq_len, d_model).
    x1 = jax.random.normal(ks[0], (2, 32, 16), jnp.float32)
    y1 = jax.block_until_ready(Transpose(1, 2, contiguous=True)(x1))
    assert y1.shape == (2, 16, 32), y1.shape
    assert jnp.array_equal(y1, jnp.transpose(x1, (0, 2, 1))), "case 1 mismatch"

    # Negative dims must behave like torch.
    y1n = jax.block_until_ready(Transpose(-1, -2)(x1))
    assert jnp.array_equal(y1n, y1), "negative-dims mismatch"

    # 2) Plain 2-D transpose.
    x2 = jax.random.normal(ks[1], (16, 32), jnp.float32)
    y2 = jax.block_until_ready(Transpose(0, 1)(x2))
    assert jnp.array_equal(y2, x2.T), "case 2 mismatch"

    # 3) Batched 4-D trailing-axes transpose.
    x3 = jax.random.normal(ks[2], (2, 4, 16, 16), jnp.float32)
    y3 = jax.block_until_ready(Transpose(2, 3)(x3))
    assert jnp.array_equal(y3, jnp.swapaxes(x3, 2, 3)), "case 3 mismatch"

    # 4) Leading-axes transpose (pure index-map copy path, no XLU work).
    x4 = jax.random.normal(ks[3], (2, 4, 16, 16), jnp.float32)
    y4 = jax.block_until_ready(Transpose(0, 1)(x4))
    assert jnp.array_equal(y4, jnp.swapaxes(x4, 0, 1)), "case 4 mismatch"

    # 5) Multi-tile grid with non-divisible boundary blocks (640 % 512,
    #    576 % 512) to exercise the tiled path + masked edges.
    x5 = jax.random.normal(ks[4], (2, 640, 576), jnp.float32)
    y5 = jax.block_until_ready(Transpose(1, 2)(x5))
    assert jnp.array_equal(y5, jnp.swapaxes(x5, 1, 2)), "case 5 mismatch"

    print("KERNEL_OK")
</pallas_src>

<mosaic_0001>
module attributes {stable_mosaic.version = 11 : i64} {
  func.func @kernel(%arg0: i32, %arg1: i32, %arg2: i32, %arg3: memref<2x32x16xf32, #tpu.memory_space<vmem>>, %arg4: memref<2x16x32xf32, #tpu.memory_space<vmem>>) attributes {dimension_semantics = [#tpu.dimension_semantics<parallel>, #tpu.dimension_semantics<parallel>, #tpu.dimension_semantics<parallel>], iteration_bounds = array<i64: 1, 1, 1>, scalar_prefetch = 0 : i64, scratch_operands = 0 : i64, tpu.core_type = #tpu.core_type<tc>, window_params = [{transform_indices = @transform_0, window_bounds = array<i64: 2, 32, 16>}, {transform_indices = @transform_1, window_bounds = array<i64: 2, 16, 32>}]} {
    %c0 = arith.constant 0 : index
    %c0_0 = arith.constant 0 : index
    %c0_1 = arith.constant 0 : index
    %0 = vector.load %arg3[%c0, %c0_0, %c0_1] : memref<2x32x16xf32, #tpu.memory_space<vmem>>, vector<2x32x16xf32>
    %1 = tpu.transpose %0, [0, 2, 1] : vector<2x32x16xf32> -> vector<2x16x32xf32>
    %c0_2 = arith.constant 0 : index
    %c0_3 = arith.constant 0 : index
    %c0_4 = arith.constant 0 : index
    %2 = vector.load %arg4[%c0_2, %c0_3, %c0_4] : memref<2x16x32xf32, #tpu.memory_space<vmem>>, vector<2x16x32xf32>
    tpu.vector_store %arg4[%c0_2, %c0_3, %c0_4], %1 {strides = array<i32>} : memref<2x16x32xf32, #tpu.memory_space<vmem>>, vector<2x16x32xf32>,
    return
  }
  func.func @transform_0(%arg0: i32, %arg1: i32, %arg2: i32) -> (i32, i32, i32) {
    %c0_i32 = arith.constant 0 : i32
    return %arg0, %arg1, %arg2 : i32, i32, i32
  }
  func.func @transform_1(%arg0: i32, %arg1: i32, %arg2: i32) -> (i32, i32, i32) {
    %c0_i32 = arith.constant 0 : i32
    return %arg0, %arg2, %arg1 : i32, i32, i32
  }
}

</mosaic_0001>

<bundles_post_ra>
// kernel: tpu_custom_call.1
= control target key start
LH: loop header
LB: loop body
LE: loop exit
PB: predicated region body
PF: predicated region fallthrough
CT: control target
= control target key end

     0   :  { %s179_s0 = inlined_call_operand.vmem [shape: f32[2,32,16], index: 0, kind: input, shape index: {}]   ;;  %s180_s1 = inlined_call_operand.hbm [shape: f32[2,16,32], index: 1, kind: output, shape index: {}]  }
   0x1   :  { %v13_v0 = vld [vmem:[%s179_s0 + $0x20] sm:$0xff]  ;;  %v14_v2 = vld [vmem:[%s179_s0 + $0x28] sm:$0xff] }
   0x2   :  { %v9_v1 = vld [vmem:[%s179_s0] sm:$0xff]  ;;  %49 = vxpose.xlu1.b32.start [1/4] (short) (narrow) %v13_v0, 16  ;;  %v10_v3 = vld [vmem:[%s179_s0 + $0x8] sm:$0xff] }
   0x3   :  { %17 = vxpose.xlu0.b32.start [1/4] (short) (narrow) %v9_v1, 16 }
   0x4   :  { %6 = vsyncpa [#allocation3], 0  ;;  %v15_v4 = vld [vmem:[%s179_s0 + $0x30] sm:$0xff]  ;;  %v16_v6 = vld [vmem:[%s179_s0 + $0x38] sm:$0xff]  ;;  %vm81_vm0 = vcmask 261120   ;;  %s130_s22 = smov [#allocation2]  }
   0x5   :  { %v11_v5 = vld [vmem:[%s179_s0 + $0x10] sm:$0xff]  ;;  %v12_v7 = vld [vmem:[%s179_s0 + $0x18] sm:$0xff]  ;;  %s91_s23 = sshll.u32 %s130_s22, 4  ;;  %s92_s23 = int_to_ptr.vmem [resolvable:$true] %s91_s23 }
   0x6   :  { %50 = vxpose.xlu1.b32.cont [2/4] (short) (narrow) %v14_v2, 16  ;;  %s106_s24 = scalar_lea.vmem %s92_s23, 512  ;;  %p111_p1 = scmp.lt.s32.totalorder %s92_s23, %s92_s23 }
   0x7   :  { %18 = vxpose.xlu0.b32.cont [2/4] (short) (narrow) %v10_v3, 16  ;;  %p107_p0 = scmp.ne.s32.totalorder %s92_s23, %s106_s24  ;;  %p112_p2 = scmp.lt.s32.totalorder %s106_s24, %s106_s24 }
   0x9   :  { %p113_p3 = por %p112_p2, %p111_p1 }
   0xa   :  { %51 = vxpose.xlu1.b32.cont [3/4] (short) (narrow) %v15_v4, 16 }
   0xb   :  { %19 = vxpose.xlu0.b32.cont [3/4] (short) (narrow) %v11_v5, 16  ;;  %p114_p4 = pnand %p113_p3, %p107_p0 }
   0xe   :  { %52 = vxpose.xlu1.b32.end [4/4] (short) (narrow) %v16_v6, 16 }
   0xf   :  { %20 = vxpose.xlu0.b32.end [4/4] (short) (narrow) %v12_v7, 16 }
  0x82   :  { %v65_v8 = vpop.trf.xlu1 }
  0x83   :  { %v33_v9 = vpop.trf.xlu0  ;;  %84 = vst.msk [vmem:[#allocation2 + $0x10] sm:$0xff] %vm81_vm0, %v65_v8 }
  0x84   :  { %82 = vst.msk [vmem:[#allocation2] sm:$0xff] %vm81_vm0, %v33_v9 }
  0x86   :  { %v66_v10 = vpop.trf.xlu1 }
  0x87   :  { %v34_v11 = vpop.trf.xlu0  ;;  %85 = vst.msk [vmem:[#allocation2 + $0x18] sm:$0xff] %vm81_vm0, %v66_v10 }
  0x88   :  { %83 = vst.msk [vmem:[#allocation2 + $0x8] sm:$0xff] %vm81_vm0, %v34_v11 }
  0x89   :  { %117 = shalt.err (!%p114_p4)
}
  0x8a   :  { %s118_s26 = scalar_lea.hbm %s180_s1, 512 }
  0x8b   :  { %p119_p5 = scmp.ne.s32.totalorder %s180_s1, %s118_s26  ;;  %p122_p6 = scmp.lt.u32.totalorder %s118_s26, %s180_s1 }
  0x8d   :  { %p124_p7 = pnand %p122_p6, %p119_p5 }
  0x8f   :  { %127 = shalt.err (!%p124_p7)
}
  0x90   :  { %s131_s2 = smov 128   ;;  %s132_s3 = smov 8  }
  0x91   :  { %97 = dma.vmem_to_hbm [thread:$0]  %s92_s23, 512, %s180_s1, [#allocation3], %s131_s2, %s131_s2, %s132_s3  }
  0x92   :  { %128 = dma.done.wait [#allocation3], 512  }
  0x93   :  { %129 = vsyncadd [#allocation3], 4294966784 }
  0x94   :  { %101 = vsyncpa [#allocation3], 1 }

</bundles_post_ra>
